<compile_context>
chip_gen: v7x
topology: tpu7x:2x2x1
jax: 0.10.0
libtpu: 0.0.40
codegen_flags: <defaults>
</compile_context>

<pallas_src>
import jax
import jax.numpy as jnp
from jax.experimental import pallas as pl
from jax.experimental.pallas import tpu as pltpu

F_DIM = 65   # feature dim fixed by the module's weight shape (65, 65)
LANE = 128
SUBLANE = 8


def _round_up(x, m):
    return ((x + m - 1) // m) * m


def _default_tile_m():
    # MXU-matched output-tile height: 128 on v5e (4x128x128 MXU),
    # 256 on v6e/v7x (2x256x256 MXU).
    try:
        kind = jax.devices()[0].device_kind.lower()
    except Exception:
        kind = ""
    return 128 if "v5" in kind else 256


def gcn_kernel(a_ref, x_ref, w_ref, b_ref, out_ref):
    # (A_tile @ X) @ W  ==  A_tile @ (X @ W)  (matmul associativity), so each
    # output row tile is computed independently with two bf16 MXU matmuls,
    # both accumulating in f32.
    ax = jnp.dot(a_ref[...], x_ref[...], preferred_element_type=jnp.float32)
    axw = jnp.dot(ax.astype(jnp.bfloat16), w_ref[...],
                  preferred_element_type=jnp.float32)
    # fused bias add + ReLU on the VPU (rides for free under MXU slack)
    out_ref[...] = jnp.maximum(axw + b_ref[...], 0.0).astype(out_ref.dtype)


def gcn_forward(inputs, weight, bias, *, tile_m=None):
    """inputs = (X, A); returns (relu(A @ X @ W + b), A) like the nn.Module."""
    X, A = inputs
    N, F = X.shape
    assert weight.shape == (F, F)
    assert A.shape == (N, N)

    Fp = _round_up(F, LANE)                       # 65 -> 128 (lane-dense)
    if tile_m is None:
        tile_m = _default_tile_m()
    tm = tile_m if N >= tile_m else _round_up(max(N, SUBLANE), SUBLANE)
    Np = _round_up(N, tm)

    # Zero-pad (zeros in padded K rows/cols and padded W/bias lanes keep the
    # first F output columns exact) and cast to bf16 for the MXU.
    Xb = jnp.pad(X.astype(jnp.bfloat16), ((0, Np - N), (0, Fp - F)))
    Ab = jnp.pad(A.astype(jnp.bfloat16), ((0, Np - N), (0, Np - N)))
    Wb = jnp.pad(weight.astype(jnp.bfloat16), ((0, Fp - F), (0, Fp - F)))
    b2 = jnp.pad(bias.astype(jnp.float32), (0, Fp - F)).reshape(1, Fp)

    grid = (Np // tm,)

    # VMEM budget: double-buffered bf16 inputs + f32 output tile + headroom.
    resident_bytes = (2 * (tm * Np + Np * Fp + Fp * Fp) * 2
                      + 2 * tm * Fp * 4 + Fp * 4)
    vmem_limit = int(min(max(2 * resident_bytes, 16 << 20), 64 << 20))

    flops = 2 * Np * Np * Fp + 2 * Np * Fp * Fp
    bytes_accessed = (Ab.size + Xb.size + Wb.size) * 2 + b2.size * 4 + Np * Fp * 4

    out = pl.pallas_call(
        gcn_kernel,
        out_shape=jax.ShapeDtypeStruct((Np, Fp), jnp.float32),
        grid_spec=pl.GridSpec(
            grid=grid,
            in_specs=[
                pl.BlockSpec((tm, Np), lambda i: (i, 0)),   # A row panel (streamed)
                pl.BlockSpec((Np, Fp), lambda i: (0, 0)),   # X (resident)
                pl.BlockSpec((Fp, Fp), lambda i: (0, 0)),   # W (resident)
                pl.BlockSpec((1, Fp), lambda i: (0, 0)),    # bias (resident)
            ],
            out_specs=pl.BlockSpec((tm, Fp), lambda i: (i, 0)),
        ),
        compiler_params=pltpu.CompilerParams(
            dimension_semantics=("parallel",),      # v7x: shard row tiles over 2 TCs
            vmem_limit_bytes=vmem_limit,
        ),
        cost_estimate=pl.CostEstimate(
            flops=flops, transcendentals=0, bytes_accessed=bytes_accessed),
    )(Ab, Xb, Wb, b2)

    out = out[:N, :F].astype(X.dtype)
    return (out, A)


def _reference(X, A, weight, bias):
    return jnp.maximum(A @ (X @ weight) + bias[None, :], 0.0)


if __name__ == "__main__":
    key = jax.random.PRNGKey(0)

    # deterministic parameters matching the module:
    # weight ~ randn(65, 65), bias = zeros(65)
    k_w, k_data = jax.random.split(key)
    weight = jax.random.normal(k_w, (F_DIM, F_DIM), dtype=jnp.float32)
    bias = jnp.zeros((F_DIM,), dtype=jnp.float32)

    ok = True
    # N = 8: tiny single-tile case; N = 300: exercises padding + the multi-step
    # row-tiled (grid > 1) pipelined path.
    for N in (8, 300):
        k_data, k_x, k_a = jax.random.split(k_data, 3)
        X = jax.random.normal(k_x, (N, F_DIM), dtype=jnp.float32)
        A = jax.random.normal(k_a, (N, N), dtype=jnp.float32)

        out, A_out = gcn_forward((X, A), weight, bias)
        out = jax.block_until_ready(out)
        A_out = jax.block_until_ready(A_out)

        ref = _reference(X, A, weight, bias)
        assert out.shape == (N, F_DIM)
        scale = jnp.maximum(jnp.max(jnp.abs(ref)), 1.0)
        rel_err = float(jnp.max(jnp.abs(out - ref)) / scale)
        assert rel_err < 5e-2, f"N={N}: scaled max err {rel_err}"
        assert jnp.array_equal(A_out, A)
        ok = ok and (rel_err < 5e-2)

    if ok:
        print("KERNEL_OK")
</pallas_src>

<mosaic_0001>
module attributes {stable_mosaic.version = 11 : i64} {
  func.func @gcn_kernel(%arg0: i32, %arg1: memref<8x8xbf16, #tpu.memory_space<vmem>>, %arg2: memref<8x128xbf16, #tpu.memory_space<vmem>>, %arg3: memref<128x128xbf16, #tpu.memory_space<vmem>>, %arg4: memref<1x128xf32, #tpu.memory_space<vmem>>, %arg5: memref<8x128xf32, #tpu.memory_space<vmem>>) attributes {dimension_semantics = [#tpu.dimension_semantics<parallel>], iteration_bounds = array<i64: 1>, scalar_prefetch = 0 : i64, scratch_operands = 0 : i64, tpu.core_type = #tpu.core_type<tc>, window_params = [{transform_indices = @transform_0, window_bounds = array<i64: 8, 8>}, {pipeline_mode = #tpu.pipeline_mode<synchronous>, transform_indices = @transform_1, window_bounds = array<i64: 8, 128>}, {pipeline_mode = #tpu.pipeline_mode<synchronous>, transform_indices = @transform_2, window_bounds = array<i64: 128, 128>}, {pipeline_mode = #tpu.pipeline_mode<synchronous>, transform_indices = @transform_3, window_bounds = array<i64: 1, 128>}, {transform_indices = @transform_4, window_bounds = array<i64: 8, 128>}]} {
    %c0 = arith.constant 0 : index
    %c0_0 = arith.constant 0 : index
    %0 = vector.load %arg1[%c0, %c0_0] : memref<8x8xbf16, #tpu.memory_space<vmem>>, vector<8x8xbf16>
    %c0_1 = arith.constant 0 : index
    %c0_2 = arith.constant 0 : index
    %1 = vector.load %arg2[%c0_1, %c0_2] : memref<8x128xbf16, #tpu.memory_space<vmem>>, vector<8x128xbf16>
    %cst = arith.constant dense<0.000000e+00> : vector<8x128xf32>
    %2 = tpu.matmul %0, %1, %cst {dimension_numbers = #tpu.dot_dimension_numbers<[1], [0], [0], [1], [0, 0, 1, 1], [], []>} : vector<8x8xbf16>, vector<8x128xbf16>, vector<8x128xf32> -> vector<8x128xf32>
    %3 = arith.truncf %2 : vector<8x128xf32> to vector<8x128xbf16>
    %c0_3 = arith.constant 0 : index
    %c0_4 = arith.constant 0 : index
    %4 = vector.load %arg3[%c0_3, %c0_4] : memref<128x128xbf16, #tpu.memory_space<vmem>>, vector<128x128xbf16>
    %cst_5 = arith.constant dense<0.000000e+00> : vector<8x128xf32>
    %5 = tpu.matmul %3, %4, %cst_5 {dimension_numbers = #tpu.dot_dimension_numbers<[1], [0], [0], [1], [0, 0, 1, 1], [], []>} : vector<8x128xbf16>, vector<128x128xbf16>, vector<8x128xf32> -> vector<8x128xf32>
    %c0_6 = arith.constant 0 : index
    %c0_7 = arith.constant 0 : index
    %6 = vector.load %arg4[%c0_6, %c0_7] : memref<1x128xf32, #tpu.memory_space<vmem>>, vector<1x128xf32>
    %7 = vector.broadcast %6 : vector<1x128xf32> to vector<8x128xf32>
    %8 = arith.addf %5, %7 : vector<8x128xf32>
    %cst_8 = arith.constant 0.000000e+00 : f32
    %9 = vector.broadcast %cst_8 : f32 to vector<8x128xf32>
    %10 = arith.maximumf %8, %9 : vector<8x128xf32>
    %c0_9 = arith.constant 0 : index
    %c0_10 = arith.constant 0 : index
    %11 = vector.load %arg5[%c0_9, %c0_10] : memref<8x128xf32, #tpu.memory_space<vmem>>, vector<8x128xf32>
    tpu.vector_store %arg5[%c0_9, %c0_10], %10 {strides = array<i32>} : memref<8x128xf32, #tpu.memory_space<vmem>>, vector<8x128xf32>,
    return
  }
  func.func @transform_0(%arg0: i32) -> (i32, i32) {
    %c0_i32 = arith.constant 0 : i32
    %c0_i32_0 = arith.constant 0 : i32
    return %arg0, %c0_i32 : i32, i32
  }
  func.func @transform_1(%arg0: i32) -> (i32, i32) {
    %c0_i32 = arith.constant 0 : i32
    %c0_i32_0 = arith.constant 0 : i32
    %c0_i32_1 = arith.constant 0 : i32
    return %c0_i32, %c0_i32_0 : i32, i32
  }
  func.func @transform_2(%arg0: i32) -> (i32, i32) {
    %c0_i32 = arith.constant 0 : i32
    %c0_i32_0 = arith.constant 0 : i32
    %c0_i32_1 = arith.constant 0 : i32
    return %c0_i32, %c0_i32_0 : i32, i32
  }
  func.func @transform_3(%arg0: i32) -> (i32, i32) {
    %c0_i32 = arith.constant 0 : i32
    %c0_i32_0 = arith.constant 0 : i32
    %c0_i32_1 = arith.constant 0 : i32
    return %c0_i32, %c0_i32_0 : i32, i32
  }
  func.func @transform_4(%arg0: i32) -> (i32, i32) {
    %c0_i32 = arith.constant 0 : i32
    %c0_i32_0 = arith.constant 0 : i32
    return %arg0, %c0_i32 : i32, i32
  }
}

</mosaic_0001>

<bundles_post_ra>
// kernel: tpu_custom_call.1
= control target key start
LH: loop header
LB: loop body
LE: loop exit
PB: predicated region body
PF: predicated region fallthrough
CT: control target
= control target key end

     0   :  { %9 = vsyncpa [#allocation3], 0  ;;  %s477_s0 = inlined_call_operand.hbm [shape: bf16[8,8], index: 0, kind: input, shape index: {}]   ;;  %s478_s1 = inlined_call_operand.hbm [shape: bf16[8,128], index: 1, kind: input, shape index: {}]   ;;  %s479_s2 = inlined_call_operand.hbm [shape: bf16[128,128], index: 2, kind: input, shape index: {}]   ;;  %s480_s3 = inlined_call_operand.vmem [shape: f32[1,128], index: 3, kind: input, shape index: {}]   ;;  %s481_s4 = inlined_call_operand.hbm [shape: f32[8,128], index: 4, kind: output, shape index: {}]  }
   0x1   :  { %10 = vsyncpa [#allocation6], 0 }
   0x2   :  { %11 = vsyncpa [#allocation4], 0  ;;  %s393_s15 = smov [#allocation5]   ;;  %s394_s17 = smov [#allocation2]  }
   0x3   :  { %s28_s16 = sshll.u32 %s393_s15, 4  ;;  %s18_s18 = sshll.u32 %s394_s17, 4  ;;  %s29_s16 = int_to_ptr.vmem [resolvable:$true] %s28_s16  ;;  %s19_s18 = int_to_ptr.vmem [resolvable:$true] %s18_s18 }
   0x4   :  { %s299_s21 = scalar_lea.hbm %s478_s1, 64 }
   0x5   :  { %p300_p0 = scmp.ne.s32.totalorder %s478_s1, %s299_s21  ;;  %p303_p1 = scmp.lt.u32.totalorder %s299_s21, %s478_s1 }
   0x7   :  { %p305_p2 = pnand %p303_p1, %p300_p0 }
   0x9   :  { %308 = shalt.err (!%p305_p2)
}
   0xa   :  { %s309_s26 = scalar_lea.vmem %s29_s16, 64  ;;  %p314_p4 = scmp.lt.s32.totalorder %s29_s16, %s29_s16 }
   0xb   :  { %p310_p3 = scmp.ne.s32.totalorder %s29_s16, %s309_s26  ;;  %p315_p5 = scmp.lt.s32.totalorder %s309_s26, %s309_s26 }
   0xd   :  { %p316_p6 = por %p315_p5, %p314_p4 }
   0xf   :  { %p317_p7 = pnand %p316_p6, %p310_p3 }
  0x11   :  { %320 = shalt.err (!%p317_p7)
}
  0x12   :  { %31 = dma.hbm_to_vmem [thread:$0]  %s478_s1, 64, %s29_s16, [#allocation6]  }
  0x13   :  { %s321_s5 = scalar_lea.hbm %s477_s0, 64 }
  0x14   :  { %p322_p8 = scmp.ne.s32.totalorder %s477_s0, %s321_s5  ;;  %p325_p9 = scmp.lt.u32.totalorder %s321_s5, %s477_s0 }
  0x16   :  { %p327_p10 = pnand %p325_p9, %p322_p8 }
  0x18   :  { %330 = shalt.err (!%p327_p10)
}
  0x19   :  { %s331_s10 = scalar_lea.vmem %s19_s18, 64  ;;  %p336_p12 = scmp.lt.s32.totalorder %s19_s18, %s19_s18 }
  0x1a   :  { %p332_p11 = scmp.ne.s32.totalorder %s19_s18, %s331_s10  ;;  %p337_p13 = scmp.lt.s32.totalorder %s331_s10, %s331_s10 }
  0x1c   :  { %p338_p0 = por %p337_p13, %p336_p12 }
  0x1e   :  { %p339_p1 = pnand %p338_p0, %p332_p11 }
  0x20   :  { %342 = shalt.err (!%p339_p1)
}
  0x21   :  { %21 = dma.hbm_to_vmem [thread:$0]  %s477_s0, 64, %s19_s18, [#allocation3]  }
  0x22   :  { %s395_s12 = smov [#allocation7]   ;;  %s343_s16 = scalar_lea.hbm %s479_s2, 1024 }
  0x23   :  { %s37_s13 = sshll.u32 %s395_s12, 4  ;;  %p344_p2 = scmp.ne.s32.totalorder %s479_s2, %s343_s16  ;;  %s38_s13 = int_to_ptr.vmem [resolvable:$true] %s37_s13 }
  0x24   :  { %p347_p3 = scmp.lt.u32.totalorder %s343_s16, %s479_s2 }
  0x26   :  { %p349_p4 = pnand %p347_p3, %p344_p2 }
  0x28   :  { %352 = shalt.err (!%p349_p4)
}
  0x29   :  { %s353_s22 = scalar_lea.vmem %s38_s13, 1024  ;;  %p358_p6 = scmp.lt.s32.totalorder %s38_s13, %s38_s13 }
  0x2a   :  { %p354_p5 = scmp.ne.s32.totalorder %s38_s13, %s353_s22  ;;  %p359_p7 = scmp.lt.s32.totalorder %s353_s22, %s353_s22 }
  0x2c   :  { %p360_p8 = por %p359_p7, %p358_p6 }
  0x2e   :  { %p361_p9 = pnand %p360_p8, %p354_p5 }
  0x30   :  { %364 = shalt.err (!%p361_p9)
}
  0x31   :  { %s396_s0 = smov 64   ;;  %s397_s18 = smov 4  }
  0x32   :  { %43 = dma.hbm_to_vmem [thread:$0]  %s479_s2, 1024, %s38_s13, [#allocation6], %s396_s0, %s396_s0, %s397_s18  }
  0x33   :  { %387 = dma.done.wait [#allocation3], 64  }
  0x34   :  { %388 = vsyncadd [#allocation3], 4294967232 }
  0x35   :  { %389 = dma.done.wait [#allocation6], 1088  }
  0x36   :  { %390 = vsyncadd [#allocation6], 4294966208  ;;  %v398_v0 = vmov 0.0   ;;  %vm399_vm0 = vmmov 0   ;;  %vm62_vm1 = vcmask 1043456   ;;  %vm58_vm2 = vcmask 64512  }
  0x37   :  { %257 = vmatprep.subr.bf16.mxu0 %v398_v0  ;;  %259 = vmatprep.mubr.msk.bf16.mxu0 %vm399_vm0, %v398_v0  ;;  %v57_v1 = vld [vmem:[#allocation5] sm:$0xf]  ;;  %v291_v3 = vld [vmem:[#allocation7] sm:$0xff]   ;;  %v56_v4 = vld [vmem:[#allocation2] sm:$0xf]  ;;  %s400_s26 = smov [#allocation8]  }
  0x38   :  { %263 = vmatprep.subr.bf16.mxu1 %v398_v0  ;;  %279 = vmatprep.mubr.msk.bf16.mxu1 %vm399_vm0, %v398_v0  ;;  %v64_v2 = vsel %vm62_vm1, %v57_v1, 0  ;;  %v292_v5 = vld [vmem:[#allocation7 + $0x8] sm:$0xff]   ;;  %v293_v6 = vld [vmem:[#allocation7 + $0x10] sm:$0xff]   ;;  %v294_v7 = vld [vmem:[#allocation7 + $0x18] sm:$0xff]   ;;  %s226_s27 = sshll.u32 %s400_s26, 4  ;;  %s227_s27 = int_to_ptr.vmem [resolvable:$true] %s226_s27 }
  0x39   :  { %258 = vmatpush3.bf16.msra.mxu0 %v64_v2  ;;  %264 = vmatpush3.bf16.msra.mxu1 %v291_v3  ;;  %v295_v8 = vld [vmem:[#allocation7 + $0x20] sm:$0xff]   ;;  %v296_v9 = vld [vmem:[#allocation7 + $0x28] sm:$0xff]   ;;  %v297_v10 = vld [vmem:[#allocation7 + $0x30] sm:$0xff]   ;;  %s365_s28 = scalar_lea.vmem %s227_s27, 128  ;;  %p370_p11 = scmp.lt.s32.totalorder %s227_s27, %s227_s27 }
  0x3a   :  { %265 = vmatprep.subr.bf16.mxu1 %v398_v0  ;;  %v298_v11 = vld [vmem:[#allocation7 + $0x38] sm:$0xff]   ;;  %p366_p10 = scmp.ne.s32.totalorder %s227_s27, %s365_s28  ;;  %p371_p12 = scmp.lt.s32.totalorder %s365_s28, %s365_s28 }
  0x3b   :  { %v237_v17 = vld [vmem:[%s480_s3] ss:$0 sm:$0xff] }
  0x3c   :  { %260 = vmatmul.mubr.msk.bf16.vlgmr.msra.gmra.mrb[0].mxu0 %vm58_vm2, %v56_v4  ;;  %p372_p13 = por %p371_p12, %p370_p11 }
  0x3d   :  { %266 = vmatpush3.bf16.msra.mxu1 %v292_v5 }
  0x3e   :  { %267 = vmatprep.subr.bf16.mxu1 %v398_v0  ;;  %p373_p0 = pnand %p372_p13, %p366_p10 }
  0x41   :  { %268 = vmatpush3.bf16.msra.mxu1 %v293_v6 }
  0x42   :  { %269 = vmatprep.subr.bf16.mxu1 %v398_v0 }
  0x45   :  { %270 = vmatpush3.bf16.msra.mxu1 %v294_v7 }
  0x46   :  { %271 = vmatprep.subr.bf16.mxu1 %v398_v0 }
  0x49   :  { %272 = vmatpush3.bf16.msra.mxu1 %v295_v8 }
  0x4a   :  { %273 = vmatprep.subr.bf16.mxu1 %v398_v0 }
  0x4d   :  { %274 = vmatpush3.bf16.msra.mxu1 %v296_v9 }
  0x4e   :  { %275 = vmatprep.subr.bf16.mxu1 %v398_v0 }
  0x51   :  { %276 = vmatpush3.bf16.msra.mxu1 %v297_v10 }
  0x52   :  { %277 = vmatprep.subr.bf16.mxu1 %v398_v0 }
  0x55   :  { %278 = vmatpush3.bf16.msra.mxu1 %v298_v11 }
 0x10f   :  { %v100_v12 = vpop.f32.mrb[0].mxu0 }
 0x110   :  { %v106_v13 = vpack.c.bf16 %v100_v12, %v100_v12  ;;  %v261_v14 = vpop.f32.mrb[1].mxu0 }
 0x111   :  { %v103_v15 = vpop.f32.mrb[2].mxu0 }
 0x112   :  { %v262_v16 = vpop.f32.mrb[3].mxu0  ;;  %280 = vmatmul.mubr.bf16.vlgmr.msra.gmra.mrb[0].mxu1 %v106_v13 }
 0x1e5   :  { %v212_v18 = vpop.f32.mrb[0].mxu1 }
 0x1e6   :  { %v213_v19 = vadd.f32 %v237_v17, %v212_v18  ;;  %v281_v20 = vpop.f32.mrb[1].mxu1 }
 0x1e7   :  { %v215_v21 = vpop.f32.mrb[2].mxu1 }
 0x1e8   :  { %v218_v22 = vmax.f32 %v213_v19, 0.0  ;;  %v282_v23 = vpop.f32.mrb[3].mxu1 }
 0x1ea   :  { %219 = vst [vmem:[#allocation8] sm:$0xff] %v218_v22 }
 0x1eb   :  { %376 = shalt.err (!%p373_p0)
}
 0x1ec   :  { %s377_s3 = scalar_lea.hbm %s481_s4, 128 }
 0x1ed   :  { %p378_p1 = scmp.ne.s32.totalorder %s481_s4, %s377_s3  ;;  %p381_p2 = scmp.lt.u32.totalorder %s377_s3, %s481_s4 }
 0x1ef   :  { %p383_p3 = pnand %p381_p2, %p378_p1 }
 0x1f1   :  { %386 = shalt.err (!%p383_p3)
}
 0x1f2   :  { %229 = dma.vmem_to_hbm [thread:$0]  %s227_s27, 128, %s481_s4, [#allocation4]  }
 0x1f3   :  { %391 = dma.done.wait [#allocation4], 128  }
 0x1f4   :  { %392 = vsyncadd [#allocation4], 4294967168 }
 0x1f5   :  { %233 = vsyncpa [#allocation3], 1 }
 0x1f6   :  { %234 = vsyncpa [#allocation6], 1 }
 0x1f7   :  { %235 = vsyncpa [#allocation4], 1 }

</bundles_post_ra>
